<compile_context>
chip_gen: v6e
topology: v6e:2x2x1
jax: 0.10.0
libtpu: 0.0.40
codegen_flags: <defaults>
</compile_context>

<pallas_src>
import functools

import jax
import jax.numpy as jnp
from jax.experimental import pallas as pl
from jax.experimental.pallas import tpu as pltpu


# ---------------------------------------------------------------------------
# Helpers
# ---------------------------------------------------------------------------
def _round_up(a, b):
    return (a + b - 1) // b * b


def _cdiv(a, b):
    return (a + b - 1) // b


def _vmem_capacity_bytes():
    """Per-generation VMEM capacity (v5e/v6e 128 MiB, v7x 64 MiB); safe fallback."""
    try:
        info = pltpu.get_tpu_info()
        cap = getattr(info, "vmem_capacity_bytes", None)
        if cap:
            return int(cap)
    except Exception:
        pass
    return 64 * 1024 * 1024  # v7x-safe fallback


def _choose_rows(m, cap_rows):
    """Row-tile size: either m itself (tiny) or a multiple of 8 that is <= m.

    Splits a would-be single block into two so both v7x TensorCores get work.
    """
    if m <= 8:
        return m
    cap_rows = max(8, (int(cap_rows) // 8) * 8)
    tm = min(cap_rows, _round_up(m, 8))
    if tm > m:                       # round-up overshot the array extent
        tm = (m // 8) * 8
    if tm >= m:                      # single block -> split across 2 cores
        tm = max(8, _round_up(_cdiv(m, 2), 8))
    return tm


# ---------------------------------------------------------------------------
# Kernels
# ---------------------------------------------------------------------------
# --- fast path: full K / N per block, no K loop, fully fused epilogue -------
def _fused_kernel(x_ref, w_ref, b_ref, o_ref):
    acc = jnp.dot(x_ref[...], w_ref[...], preferred_element_type=jnp.float32)
    acc = acc + b_ref[...].astype(jnp.float32)
    o_ref[...] = jnp.maximum(acc, 0.0).astype(o_ref.dtype)


def _fused_kernel_res(x_ref, w_ref, b_ref, res_ref, o_ref):
    acc = jnp.dot(x_ref[...], w_ref[...], preferred_element_type=jnp.float32)
    acc = acc + b_ref[...].astype(jnp.float32) + res_ref[...].astype(jnp.float32)
    o_ref[...] = jnp.maximum(acc, 0.0).astype(o_ref.dtype)


# --- tiled fallback: 3-D grid, f32 accumulator, K innermost ------------------
def _tiled_kernel(x_ref, w_ref, b_ref, o_ref, acc_ref):
    k = pl.program_id(2)
    prod = jnp.dot(x_ref[...], w_ref[...], preferred_element_type=jnp.float32)

    @pl.when(k == 0)
    def _():                         # direct write: no zero-init RMW
        acc_ref[...] = prod

    @pl.when(k > 0)
    def _():
        acc_ref[...] += prod

    @pl.when(k == pl.num_programs(2) - 1)
    def _():
        acc = acc_ref[...] + b_ref[...].astype(jnp.float32)
        o_ref[...] = jnp.maximum(acc, 0.0).astype(o_ref.dtype)


def _tiled_kernel_res(x_ref, w_ref, b_ref, res_ref, o_ref, acc_ref):
    k = pl.program_id(2)
    prod = jnp.dot(x_ref[...], w_ref[...], preferred_element_type=jnp.float32)

    @pl.when(k == 0)
    def _():
        acc_ref[...] = prod

    @pl.when(k > 0)
    def _():
        acc_ref[...] += prod

    @pl.when(k == pl.num_programs(2) - 1)
    def _():
        acc = acc_ref[...] + b_ref[...].astype(jnp.float32)
        acc = acc + res_ref[...].astype(jnp.float32)   # widen residual on VPU
        o_ref[...] = jnp.maximum(acc, 0.0).astype(o_ref.dtype)


# ---------------------------------------------------------------------------
# Wrapper
# ---------------------------------------------------------------------------
# Tiled-fallback caps (f32 double-buffered footprint ~13-15 MiB: fits all gens).
_TM_MAX = 512
_TN_MAX = 512
_TK_MAX = 1024


def propagator_forward(x, weight, bias, res=None):
    """JAX/Pallas equivalent of Propagator.forward.

    x      : (..., D_in)
    weight : (D_out, D_in)   -- nn.Linear convention
    bias   : (D_out,)
    res    : optional (..., D_out), any dtype (widened in-kernel)
    returns: (..., D_out) with x.dtype
    """
    s_x = x.shape
    d_in = s_x[-1]
    d_out = weight.shape[0]
    out_dtype = x.dtype  # NOTE: matches x (the usual case); PyTorch promotion not modeled.

    x2 = x.reshape(-1, d_in)                 # view, no copy
    m = x2.shape[0]
    res2 = None if res is None else res.reshape(-1, d_out)

    # One-time transpose so the MXU always sees a standard (TK, TN) rhs tile.
    wt = weight.T                            # (K, N)
    b2 = bias.reshape(1, d_out)

    K, N = d_in, d_out
    isz_x = jnp.dtype(x.dtype).itemsize
    isz_w = jnp.dtype(weight.dtype).itemsize
    isz_b = jnp.dtype(bias.dtype).itemsize
    isz_o = jnp.dtype(out_dtype).itemsize
    isz_r = 0 if res is None else jnp.dtype(res.dtype).itemsize

    # Per-generation VMEM budgeting (v7x: 64 MiB physical; v5e/v6e: 128 MiB).
    vmem_cap = _vmem_capacity_bytes()
    budget = min(int(vmem_cap * 0.55), 64 << 20)            # resident tile target
    vmem_limit = max(32 << 20, min(int(vmem_cap * 0.80), 100 << 20))

    # ------------------------------------------------------------------ tiles
    w_resident = 2 * (K * N * isz_w + N * isz_b)            # weight + bias, 2 bufs
    per_row = 2 * (K * isz_x + N * isz_o + N * isz_r)       # x + out (+ res) per row

    fast_path = (
        w_resident <= budget
        and (budget - w_resident) // max(per_row, 1) >= max(8, min(m, 64))
    )

    if fast_path:
        # Weight resident in VMEM; x streamed from HBM exactly once.
        tk, tn = K, N
        tm = _choose_rows(m, (budget - w_resident) // max(per_row, 1))
        grid = (_cdiv(m, tm), 1)
        grid_k = 1
    else:
        # Tiled fallback for large weights.
        tn = N if N <= _TN_MAX else _TN_MAX
        tk = K if K <= _TK_MAX else _TK_MAX
        tm = _choose_rows(m, _TM_MAX)
        if tk < K and K % tk != 0:
            # Only the reduction axis ever needs zero padding (rare path).
            k_pad = _round_up(K, tk)
            x2 = jnp.pad(x2, ((0, 0), (0, k_pad - K)))
            wt = jnp.pad(wt, ((0, k_pad - K), (0, 0)))
            K = k_pad
        grid_k = _cdiv(K, tk)
        grid = (_cdiv(m, tm), _cdiv(N, tn), grid_k)

    # ------------------------------------------------------------- block specs
    if grid_k == 1:
        grid = (grid[0], grid[1])
        x_spec = pl.BlockSpec((tm, tk), lambda i, j: (i, 0))
        w_spec = pl.BlockSpec((tk, tn), lambda i, j: (0, j))
        b_spec = pl.BlockSpec((1, tn), lambda i, j: (0, j))
        io_spec = pl.BlockSpec((tm, tn), lambda i, j: (i, j))
        kernel = _fused_kernel_res if res is not None else _fused_kernel
        scratch = []
        dims = ("parallel", "parallel")
    else:
        x_spec = pl.BlockSpec((tm, tk), lambda i, j, k: (i, k))
        w_spec = pl.BlockSpec((tk, tn), lambda i, j, k: (k, j))
        b_spec = pl.BlockSpec((1, tn), lambda i, j, k: (0, j))
        io_spec = pl.BlockSpec((tm, tn), lambda i, j, k: (i, j))
        kernel = _tiled_kernel_res if res is not None else _tiled_kernel
        scratch = [pltpu.VMEM((tm, tn), jnp.float32)]
        dims = ("parallel", "parallel", "arbitrary")

    in_specs = [x_spec, w_spec, b_spec]
    operands = [x2, wt, b2]
    if res is not None:
        in_specs.append(io_spec)
        operands.append(res2)

    # -------------------------------------------------------------- cost hint
    grid_m, grid_n = grid[0], grid[1]
    w_passes = 1 if (grid_n == 1 and grid_k == 1) else grid_m
    bytes_accessed = (
        x2.size * isz_x * grid_n                 # x re-read once per N tile
        + wt.size * isz_w * w_passes             # W re-read once per M tile (if tiled)
        + b2.size * isz_b * w_passes
        + m * N * isz_o                          # output written once
        + (m * N * isz_r if res is not None else 0)
    )
    cost = pl.CostEstimate(
        flops=2 * m * d_in * N,
        transcendentals=0,
        bytes_accessed=int(bytes_accessed),
    )

    out = pl.pallas_call(
        kernel,
        out_shape=jax.ShapeDtypeStruct((m, N), out_dtype),
        grid_spec=pltpu.PrefetchScalarGridSpec(
            num_scalar_prefetch=0,
            grid=grid,
            in_specs=in_specs,
            out_specs=io_spec,
            scratch_shapes=scratch,
        ),
        compiler_params=pltpu.CompilerParams(
            dimension_semantics=dims,
            vmem_limit_bytes=int(vmem_limit),
        ),
        cost_estimate=cost,
    )(*operands)

    return out.reshape(tuple(s_x[:-1]) + (N,))


# ---------------------------------------------------------------------------
# Test
# ---------------------------------------------------------------------------
if __name__ == "__main__":
    # Small shapes consistent with the module: x is (batch, seq, input_size).
    batch, seq, input_size, output_size = 2, 8, 32, 64

    key = jax.random.PRNGKey(0)
    k_x, k_w, k_b, k_r = jax.random.split(key, 4)

    x = jax.random.normal(k_x, (batch, seq, input_size), dtype=jnp.float32)
    # Deterministic parameter init mimicking nn.Linear's uniform(-1/sqrt(in), 1/sqrt(in))
    bound = 1.0 / jnp.sqrt(jnp.float32(input_size))
    weight = jax.random.uniform(k_w, (output_size, input_size),
                                minval=-bound, maxval=bound, dtype=jnp.float32)
    bias = jax.random.uniform(k_b, (output_size,),
                              minval=-bound, maxval=bound, dtype=jnp.float32)
    res = jax.random.normal(k_r, (batch, seq, output_size), dtype=jnp.float32)

    fwd_res = jax.jit(propagator_forward)
    fwd_nores = jax.jit(functools.partial(propagator_forward, res=None))

    # Run with residual
    out = fwd_res(x, weight, bias, res)
    out = jax.block_until_ready(out)

    # Run without residual (res=None branch -> specialized kernel)
    out_no_res = fwd_nores(x, weight, bias)
    out_no_res = jax.block_until_ready(out_no_res)

    # Reference check in plain JAX
    ref = jnp.maximum(x.reshape(-1, input_size) @ weight.T + bias
                      + res.reshape(-1, output_size), 0.0
                      ).reshape(batch, seq, output_size)
    ref_no = jnp.maximum(x.reshape(-1, input_size) @ weight.T + bias, 0.0
                         ).reshape(batch, seq, output_size)

    assert out.shape == (batch, seq, output_size)
    assert out_no_res.shape == (batch, seq, output_size)
    assert jnp.allclose(out, ref, atol=1e-4, rtol=1e-4)
    assert jnp.allclose(out_no_res, ref_no, atol=1e-4, rtol=1e-4)

    print("KERNEL_OK")
</pallas_src>

<mosaic_0001>
module attributes {stable_mosaic.version = 11 : i64} {
  func.func @_fused_kernel_res(%arg0: i32, %arg1: i32, %arg2: memref<8x32xf32, #tpu.memory_space<vmem>>, %arg3: memref<32x64xf32, #tpu.memory_space<vmem>>, %arg4: memref<1x64xf32, #tpu.memory_space<vmem>>, %arg5: memref<8x64xf32, #tpu.memory_space<vmem>>, %arg6: memref<8x64xf32, #tpu.memory_space<vmem>>) attributes {dimension_semantics = [#tpu.dimension_semantics<parallel>, #tpu.dimension_semantics<parallel>], iteration_bounds = array<i64: 2, 1>, scalar_prefetch = 0 : i64, scratch_operands = 0 : i64, tpu.core_type = #tpu.core_type<tc>, window_params = [{transform_indices = @transform_0, window_bounds = array<i64: 8, 32>}, {transform_indices = @transform_1, window_bounds = array<i64: 32, 64>}, {transform_indices = @transform_2, window_bounds = array<i64: 1, 64>}, {transform_indices = @transform_3, window_bounds = array<i64: 8, 64>}, {transform_indices = @transform_4, window_bounds = array<i64: 8, 64>}]} {
    %c0 = arith.constant 0 : index
    %c0_0 = arith.constant 0 : index
    %0 = vector.load %arg2[%c0, %c0_0] : memref<8x32xf32, #tpu.memory_space<vmem>>, vector<8x32xf32>
    %c0_1 = arith.constant 0 : index
    %c0_2 = arith.constant 0 : index
    %1 = vector.load %arg3[%c0_1, %c0_2] : memref<32x64xf32, #tpu.memory_space<vmem>>, vector<32x64xf32>
    %cst = arith.constant dense<0.000000e+00> : vector<8x64xf32>
    %2 = tpu.matmul %0, %1, %cst {dimension_numbers = #tpu.dot_dimension_numbers<[1], [0], [0], [1], [0, 0, 1, 1], [], []>} : vector<8x32xf32>, vector<32x64xf32>, vector<8x64xf32> -> vector<8x64xf32>
    %c0_3 = arith.constant 0 : index
    %c0_4 = arith.constant 0 : index
    %3 = vector.load %arg4[%c0_3, %c0_4] : memref<1x64xf32, #tpu.memory_space<vmem>>, vector<1x64xf32>
    %4 = vector.broadcast %3 : vector<1x64xf32> to vector<8x64xf32>
    %5 = arith.addf %2, %4 : vector<8x64xf32>
    %c0_5 = arith.constant 0 : index
    %c0_6 = arith.constant 0 : index
    %6 = vector.load %arg5[%c0_5, %c0_6] : memref<8x64xf32, #tpu.memory_space<vmem>>, vector<8x64xf32>
    %7 = arith.addf %5, %6 : vector<8x64xf32>
    %cst_7 = arith.constant 0.000000e+00 : f32
    %8 = vector.broadcast %cst_7 : f32 to vector<8x64xf32>
    %9 = arith.maximumf %7, %8 : vector<8x64xf32>
    %c0_8 = arith.constant 0 : index
    %c0_9 = arith.constant 0 : index
    %10 = vector.load %arg6[%c0_8, %c0_9] : memref<8x64xf32, #tpu.memory_space<vmem>>, vector<8x64xf32>
    tpu.vector_store %arg6[%c0_8, %c0_9], %9 {strides = array<i32>} : memref<8x64xf32, #tpu.memory_space<vmem>>, vector<8x64xf32>,
    return
  }
  func.func @transform_0(%arg0: i32, %arg1: i32) -> (i32, i32) {
    %c0_i32 = arith.constant 0 : i32
    %c0_i32_0 = arith.constant 0 : i32
    return %arg0, %c0_i32 : i32, i32
  }
  func.func @transform_1(%arg0: i32, %arg1: i32) -> (i32, i32) {
    %c0_i32 = arith.constant 0 : i32
    %c0_i32_0 = arith.constant 0 : i32
    return %c0_i32, %arg1 : i32, i32
  }
  func.func @transform_2(%arg0: i32, %arg1: i32) -> (i32, i32) {
    %c0_i32 = arith.constant 0 : i32
    %c0_i32_0 = arith.constant 0 : i32
    return %c0_i32, %arg1 : i32, i32
  }
  func.func @transform_3(%arg0: i32, %arg1: i32) -> (i32, i32) {
    %c0_i32 = arith.constant 0 : i32
    return %arg0, %arg1 : i32, i32
  }
  func.func @transform_4(%arg0: i32, %arg1: i32) -> (i32, i32) {
    %c0_i32 = arith.constant 0 : i32
    return %arg0, %arg1 : i32, i32
  }
}

</mosaic_0001>

<bundles_post_ra>
// kernel: propagator_forward.1
= control target key start
LH: loop header
LB: loop body
LE: loop exit
PB: predicated region body
PF: predicated region fallthrough
CT: control target
= control target key end

     0   :  { %9 = vsyncpa [#allocation3], 0  ;;  %s1058_s0 = inlined_call_operand.hbm [shape: f32[16,32], index: 0, kind: input, shape index: {}]   ;;  %s1059_s1 = inlined_call_operand.hbm [shape: f32[32,64], index: 1, kind: input, shape index: {}]   ;;  %s1060_s2 = inlined_call_operand.vmem [shape: f32[1,64], index: 2, kind: input, shape index: {}]   ;;  %s1061_s3 = inlined_call_operand.hbm [shape: f32[16,64], index: 3, kind: input, shape index: {}]   ;;  %s1062_s4 = inlined_call_operand.hbm [shape: f32[16,64], index: 4, kind: output, shape index: {}]  }
   0x1   :  { %11 = vsyncpa [#allocation3 + $0x1], 0 }
   0x2   :  { %12 = vsyncpa [#allocation6], 0 }
   0x3   :  { %13 = vsyncpa [#allocation4], 0 }
   0x4   :  { %15 = vsyncpa [#allocation4 + $0x1], 0  ;;  %s854_s15 = smov 0   ;;  %s856_s16 = smov 0  }
   0x5   :  { %s858_s17 = smov 0   ;;  %s860_s18 = smov 0  }
   0x6   :  { %s862_s19 = smov 0   ;;  %s864_s20 = smov 0  }
   0x7 LB: > { %s33_s21 = sadd.s32 1, %s815_s19  ;;  %s40_s22 = sadd.s32 1, %s807_s17  ;;  %s819_s20 = sphi %s864_s20, %s21_s20   ;;  %s815_s19 = sphi %s862_s19, %s1082_s19   ;;  %s811_s18 = sphi %s860_s18, %s1081_s18   ;;  %s807_s17 = sphi %s858_s17, %s1080_s17   ;;  %s803_s16 = sphi %s856_s16, %s1079_s16   ;;  %s799_s15 = sphi %s854_s15, %s1078_s15  }
   0x8   : > { %p35_p0 = scmp.ge.s32.totalorder %s33_s21, 2  ;;  %p47_p1 = scmp.ne.s32.totalorder %s807_s17, %s803_s16 }
   0x9   : > { %p48_p2 = scmp.eq.s32.totalorder %s819_s20, 0  ;;  %p593_p5 = scmp.lt.s32.totalorder %s819_s20, 2 }
   0xa   : > { %s1084_s21 = smov (%p35_p0, %s33_s21), 0  ;;  %s206_s24 = sand.u32 1, %s819_s20  }
   0xb   : > { %p49_p4 = por %p48_p2, %p47_p1  ;;  %s37_s23 = ssub.s32 %s815_s19, %s1084_s21 }
   0xc   : > { %p38_p6 = scmp.eq.s32.totalorder %s37_s23, 0  ;;  %s208_s25 = sand.u32 1, %s807_s17  }
   0xd   : > { %s537_s26 = sshll.u32 %s815_s19, 7  ;;  %s904_s28 = sshll.u32 %s208_s25, 3 }
   0xe   : > { %s902_s27 = scalar_select %p38_p6, %s807_s17, %s40_s22  }
   0xf   : > { %s215_s5 = scalar_lea.hbm %s1058_s0, %s537_s26  ;;  %p911_p7 = pnand %p593_p5, %p49_p4 }
  0x10   : > { %s210_s7 = scalar_lea.vmem [#allocation2], %s904_s28  ;;  %s916_s9 = scalar_lea.sflag [#allocation3], %s206_s24 }
  0x11   : > { %s217_s8 = sshll.u32 %s210_s7, 4  ;;  %p651_p8 = pneg %p911_p7  ;;  %s218_s8 = int_to_ptr.vmem [resolvable:$true] %s217_s8 }
  0x12   : > { %s662_s10 = scalar_lea.vmem %s218_s8, 128  ;;  %s821_s11 = smov [#allocation2]  }
  0x13   : > { %p663_p9 = scmp.ne.s32.totalorder %s218_s8, %s662_s10  ;;  %s667_s12 = sshll.u32 %s821_s11, 4  ;;  %s668_s12 = int_to_ptr.vmem [resolvable:$false] %s667_s12 }
  0x14   : > { %s669_s13 = scalar_lea.vmem %s668_s12, 256  ;;  %p670_p12 = scmp.lt.s32.totalorder %s218_s8, %s668_s12 }
  0x15   : > { %p665_p10 = pnand %p663_p9, %p651_p8  ;;  %p671_p13 = scmp.lt.s32.totalorder %s669_s13, %s662_s10 }
  0x17   : > { %p666_p11 = pneg %p665_p10  ;;  %p672_p0 = por %p671_p13, %p670_p12 }
  0x19   : > { %p673_p2 = pnand %p672_p0, %p666_p11 }
  0x1b   : > { %676 = shalt.err (!%p673_p2)
}
  0x1c   : > { %584 = dma.hbm_to_vmem [thread:$0]  (!%p911_p7), %s215_s5, 128, %s218_s8, %s916_s9  }
  0x1d   : > { %s927_s14 = sadd.s32 4294967295, %s819_s20   ;;  %s531_s22 = sadd.s32 4294967294, %s819_s20  }
  0x1e   : > { %p53_p4 = scmp.ne.s32.totalorder %s803_s16, %s799_s15  ;;  %p1064_p5 = scmp.eq.s32.totalorder %s927_s14, 0 }
  0x1f   : > { %p159_p6 = scmp.eq.s32.totalorder %s927_s14, 1  ;;  %p165_p9 = scmp.eq.s32.totalorder %s531_s22, 1 }
  0x20   : > { %p532_p10 = scmp.ge.s32.totalorder %s819_s20, 1  ;;  %p937_p11 = por %p1064_p5, %p53_p4 }
  0x21   : > { %p944_p12 = por %p159_p6, %p47_p1  ;;  %p948_p13 = por %p165_p9, %p53_p4 }
  0x22   : > { %s1067_s23 = scalar_select %p937_p11, 1, 0 }
  0x23   : > { %s1068_s24 = scalar_select %p944_p12, 1, 0 }
  0x24   : > { %s1069_s25 = scalar_select %p948_p13, 1, 0 }
  0x25   : > { %p172_p0 = scmp.lt.s32.totalorder %s819_s20, 3  ;;  %s822_s30 = smov [#allocation5]  }
  0x26   : > { %s186_s5 = sshll.u32 %s822_s30, 4  ;;  %s234_s10 = scalar_lea.hbm %s1061_s3, %s537_s26  ;;  %s962_s5 = int_to_ptr.vmem [resolvable:$true] %s186_s5 }
  0x27   : > { %p953_p2 = pnand %p532_p10, %p172_p0  ;;  %s228_s11 = scalar_lea.vmem [#allocation7], %s904_s28 }
  0x28   : > { %s236_s12 = sshll.u32 %s228_s11, 4  ;;  %s823_s30 = smov [#allocation7]   ;;  %s237_s12 = int_to_ptr.vmem [resolvable:$true] %s236_s12 }
  0x29   : > { %p577_p1 = pneg %p953_p2  ;;  %s690_s22 = scalar_lea.vmem %s237_s12, 128 }
  0x2a   : > { %p691_p6 = scmp.ne.s32.totalorder %s237_s12, %s690_s22  ;;  %s695_s26 = sshll.u32 %s823_s30, 4  ;;  %s696_s26 = int_to_ptr.vmem [resolvable:$false] %s695_s26 }
  0x2b   : > { %p969_p4 = pnand %p577_p1, %p1064_p5  ;;  %s697_s7 = scalar_lea.vmem %s696_s26, 256 }
  0x2c   : > { %p693_p9 = pnand %p691_p6, %p651_p8  ;;  %p698_p0 = scmp.lt.s32.totalorder %s237_s12, %s696_s26 }
  0x2d   : > { %p699_p3 = scmp.lt.s32.totalorder %s697_s7, %s690_s22 }
  0x2e   : > { %p694_p10 = pneg %p693_p9 }
  0x2f   : > { %p700_p13 = por %p699_p3, %p698_p0 }
  0x31   : > { %p701_p12 = pnand %p700_p13, %p694_p10 }
  0x33   : > { %704 = shalt.err (!%p701_p12)
}
  0x34   : > { %587 = dma.hbm_to_vmem [thread:$0]  (!%p911_p7), %s234_s10, 128, %s237_s12, %s916_s9  }
  0x35   : > { %p707_p8 = pneg %p969_p4  ;;  %s716_s28 = scalar_lea.vmem %s962_s5, 512 }
  0x36   : > { %p717_p1 = scmp.ne.s32.totalorder %s962_s5, %s716_s28  ;;  %p724_p5 = scmp.lt.s32.totalorder %s962_s5, %s962_s5 }
  0x37   : > { %p725_p11 = scmp.lt.s32.totalorder %s716_s28, %s716_s28 }
  0x38   : > { %p719_p6 = pnand %p717_p1, %p707_p8 }
  0x39   : > { %p726_p3 = por %p725_p11, %p724_p5 }
  0x3a   : > { %p720_p9 = pneg %p719_p6 }
  0x3c   : > { %p727_p13 = pnand %p726_p3, %p720_p9 }
  0x3e   : > { %730 = shalt.err (!%p727_p13)
}
  0x3f   : > { %s824_s8 = smov 128   ;;  %s825_s6 = smov 8  }
  0x40   : > { %580 = dma.hbm_to_vmem [thread:$0]  (!%p969_p4), %s1059_s1, 512, %s962_s5, [#allocation6], %s824_s8, %s824_s8, %s825_s6  }
  0x41   : > { %245 = sbr.rel (%p953_p2) target bundleno = 298 (0x12a), region = 36  ;;  %s247_s9 = sand.u32 (!%p953_p2), 1, %s927_s14  }
  0x42   : > { %s249_s10 = sand.u32 (!%p953_p2), 1, %s803_s16   ;;  %s248_s30 = scalar_lea.sflag (!%p953_p2), [#allocation3], %s247_s9 }
  0x43   : > { %s997_s12 = sshll.u32 (!%p953_p2), %s249_s10, 3  ;;  %p1072_p7 = scmp.ne.s32.totalorder (!%p953_p2), %s1067_s23, 0 }
  0x44   : > { %s251_s26 = scalar_lea.vmem (!%p953_p2), [#allocation2], %s997_s12 }
  0x46   : > { %782 = dma.done.wait (%p1072_p7), %s248_s30, 128  }
  0x47   : > { %784 = vsyncadd (%p1072_p7), %s248_s30, 4294967168  ;;  %p1073_p5 = scmp.eq.s32.totalorder %s927_s14, 0 }
  0x49   : > { %786 = dma.done.wait (%p1073_p5), [#allocation6], 512   ;;  %p1074_p11 = pmov %p1073_p5 }
  0x4a   : > { %s264_s29 = scalar_lea.vmem [#allocation7], %s997_s12 }
  0x4b   : > { %788 = vsyncadd (%p1074_p11), [#allocation6], 4294966784 }
  0x4c   : > { %790 = dma.done.wait (%p1072_p7), %s248_s30, 128  }
  0x4d   : > { %792 = vsyncadd (%p1072_p7), %s248_s30, 4294967168  ;;  %v826_v0 = vmov 0.0   ;;  %vm827_vm0 = vmmov 0   ;;  %v304_v1 = vld [vmem:[#allocation5 + $0x18] sm:$0xff]  ;;  %v303_v2 = vld [vmem:[#allocation5 + $0x10] sm:$0xff]  ;;  %vm312_vm1 = vcmask 261120  }
  0x4e   : > { %556 = vmatprep.subr.mxu0 %v826_v0  ;;  %564 = vmatprep.mubr.msk.f32.mxu0 %vm827_vm0, %v826_v0  ;;  %v302_v3 = vld [vmem:[#allocation5 + $0x8] sm:$0xff]  ;;  %v301_v4 = vld [vmem:[#allocation5] sm:$0xff]  ;;  %v300_v5 = vld [vmem:[%s251_s26] sm:$0xff]  ;;  %s548_s5 = sshll.u32 %s811_s18, 7  ;;  %s296_s13 = scalar_lea.vmem [#allocation8], %s997_s12  ;;  %vm389_vm2 = vcmask 523264  }
  0x4f   : > { %557 = vmatpush3.msra.mxu0 %v304_v1  ;;  %v545_v6 = vld [vmem:[%s1060_s2] ss:$0 sm:$0xff]  ;;  %v386_v8 = vld [vmem:[%s264_s29] sm:$0xff]  ;;  %s406_s7 = sshll.u32 %s296_s13, 4  ;;  %s404_s6 = scalar_lea.hbm %s1062_s4, %s548_s5  ;;  %s407_s7 = int_to_ptr.vmem [resolvable:$true] %s406_s7 }
  0x50   : > { %558 = vmatprep.subr.mxu0 %v826_v0  ;;  %s392_s11 = scalar_lea.sflag [#allocation4], %s249_s10  ;;  %s731_s22 = scalar_lea.vmem %s407_s7, 128 }
  0x51   : > { %559 = vmatpush3.msra.mxu0 %v303_v2  ;;  %p732_p12 = scmp.ne.s32.totalorder %s407_s7, %s731_s22  ;;  %p1075_p2 = scmp.ne.s32.totalorder %s1068_s24, 0 }
  0x52   : > { %560 = vmatprep.subr.mxu0 %v826_v0  ;;  %s828_s9 = smov [#allocation8]  }
  0x53   : > { %561 = vmatpush3.msra.mxu0 %v302_v3  ;;  %p733_p4 = pnand %p732_p12, %p1075_p2  ;;  %s735_s18 = sshll.u32 %s828_s9, 4  ;;  %s736_s18 = int_to_ptr.vmem [resolvable:$false] %s735_s18 }
  0x54   : > { %562 = vmatprep.subr.mxu0 %v826_v0  ;;  %s737_s12 = scalar_lea.vmem %s736_s18, 256  ;;  %p738_p0 = scmp.lt.s32.totalorder %s407_s7, %s736_s18 }
  0x55   : > { %563 = vmatpush3.msra.mxu0 %v301_v4  ;;  %p734_p10 = pneg %p733_p4  ;;  %p739_p8 = scmp.lt.s32.totalorder %s737_s12, %s731_s22 }
  0x56   : > { %565 = vmatmul.mubr.msk.f32.vlgmr.msra.gmra.mxu0 %vm312_vm1, %v300_v5 }
  0x57   : > { %p740_p1 = por %p739_p8, %p738_p0 }
  0x59   : > { %p741_p6 = pnand %p740_p1, %p734_p10 }
 0x116   : > { %v382_v7 = vpop.f32.mrf.mxu0 }
 0x117   : > { %v383_v9 = vadd.f32 %v545_v6, %v382_v7 }
 0x118   : > { %v566_v10 = vpop.f32.mrf.mxu0 }
 0x119   : > { %v387_v11 = vadd.f32 %v386_v8, %v383_v9 }
 0x11b   : > { %v388_v12 = vmax.f32 %v387_v11, 0.0 }
 0x11d   : > { %390 = vst.msk [vmem:[%s296_s13] sm:$0xff] %vm389_vm2, %v388_v12 }
 0x11e   : > { %744 = shalt.err (!%p741_p6)
}
 0x11f   : > { %s745_s30 = scalar_lea.hbm %s404_s6, 128  ;;  %s749_s29 = scalar_lea.hbm %s1062_s4, 256 }
 0x120   : > { %p746_p9 = scmp.ne.s32.totalorder %s404_s6, %s745_s30  ;;  %p750_p7 = scmp.lt.s32.totalorder %s404_s6, %s1062_s4 }
 0x121   : > { %p751_p5 = scmp.lt.s32.totalorder %s749_s29, %s745_s30 }
 0x122   : > { %p747_p3 = pnand %p746_p9, %p1075_p2 }
 0x123   : > { %p752_p11 = por %p751_p5, %p750_p7 }
 0x124   : > { %p748_p13 = pneg %p747_p3 }
 0x126   : > { %p753_p12 = pnand %p752_p11, %p748_p13 }
 0x128   : > { %756 = shalt.err (!%p753_p12)
}
 0x129   : > { %575 = dma.vmem_to_hbm [thread:$0]  (%p1075_p2), %s407_s7, 128, %s404_s6, %s392_s11  }
 0x12a PF: > { %s418_s5 = sand.u32 1, %s799_s15   ;;  %p1076_p4 = scmp.ne.s32.totalorder %s1069_s25, 0 }
 0x12b   : > { %p1077_p10 = scmp.ge.s32.totalorder %s819_s20, 2  ;;  %s419_s13 = scalar_lea.sflag [#allocation4], %s418_s5 }
 0x12d   : > { %p589_p0 = pnand %p1077_p10, %p1076_p4 }
 0x12f   : > { %p590_p8 = pneg %p589_p0 }
 0x131   : > { %794 = dma.done.wait (%p590_p8), %s419_s13, 128  }
 0x132   : > { %796 = vsyncadd (%p590_p8), %s419_s13, 4294967168  ;;  %s21_s20 = sadd.s32 1, %s819_s20   ;;  %s1078_s15 = smov %s803_s16 }
 0x133   : > { %p18_p1 = scmp.ge.s32.totalorder %s21_s20, 4   ;;  %s1079_s16 = smov %s807_s17 }
 0x134   : > { %s1080_s17 = smov %s902_s27  ;;  %s1081_s18 = smov %s815_s19 }
 0x135   : > { %s1082_s19 = smov %s1084_s21  ;;  %20 = sbr.rel (!%p18_p1) target bundleno = 7 (0x7), region = 100 }
 0x13a   :  { %424 = vsyncpa [#allocation3], 1 }
 0x13b   :  { %426 = vsyncpa [#allocation3 + $0x1], 1 }
 0x13c   :  { %427 = vsyncpa [#allocation6], 1 }
 0x13d   :  { %428 = vsyncpa [#allocation4], 1 }
 0x13e   :  { %430 = vsyncpa [#allocation4 + $0x1], 1 }

</bundles_post_ra>
